<compile_context>
chip_gen: v7x
topology: tpu7x:2x2x1
jax: 0.10.0
libtpu: 0.0.40
codegen_flags: <defaults>
</compile_context>

<pallas_src>
import functools

import jax
import jax.numpy as jnp
from jax.experimental import pallas as pl
from jax.experimental.pallas import tpu as pltpu


# ----------------------------------------------------------------------------
# Kernels
# ----------------------------------------------------------------------------
def _tower_kernel_eval(x_ref, w_ref, b_ref, o_ref):
    # Linear: x @ W + b   (MXU matmul, f32 accumulation)
    y = jnp.dot(x_ref[...], w_ref[...], preferred_element_type=jnp.float32)
    y = y + b_ref[...]                      # (TB, D_out) + (1, D_out) broadcast
    # ReLU; Dropout(p) in eval mode == identity (torch eval semantics).
    o_ref[...] = jnp.maximum(y, 0.0).astype(o_ref.dtype)


def _tower_kernel_train(x_ref, w_ref, b_ref, bits_ref, o_ref, *,
                        keep_threshold, inv_keep):
    y = jnp.dot(x_ref[...], w_ref[...], preferred_element_type=jnp.float32)
    y = y + b_ref[...]
    y = jnp.maximum(y, 0.0)
    # Inverted dropout: single uint32 threshold compare (no shift/cast/mul).
    keep = bits_ref[...] < jnp.uint32(keep_threshold)
    o_ref[...] = jnp.where(keep, y * inv_keep, 0.0).astype(o_ref.dtype)


# ----------------------------------------------------------------------------
# Wrapper
# ----------------------------------------------------------------------------
def _round_up(n, m):
    return ((n + m - 1) // m) * m


def tower_forward(x, w, b, *, drop_prob=0.1, training=False, rng_key=None,
                  tile_b=512):
    """x: [B, D_in] f32, w: [D_in, D_out] f32, b: [D_out] f32 -> [B, D_out]."""
    B, D_in = x.shape
    D_out = w.shape[1]
    assert w.shape[0] == D_in and b.shape == (D_out,)
    assert D_out % 128 == 0, "keep output lane-dense (multiple of 128)"

    # Sublane granularity: 8 for f32, 16 for bf16 (packed sublanes).
    sub = 16 if x.dtype == jnp.bfloat16 else 8
    tile_b = min(_round_up(tile_b, sub), _round_up(B, sub))
    tile_b = max(tile_b, sub)

    b2 = b.reshape(1, D_out)
    grid = (pl.cdiv(B, tile_b),)

    x_spec = pl.BlockSpec((tile_b, D_in), lambda i: (i, 0))
    w_spec = pl.BlockSpec((D_in, D_out), lambda i: (0, 0))   # VMEM-resident
    b_spec = pl.BlockSpec((1, D_out), lambda i: (0, 0))      # VMEM-resident
    o_spec = pl.BlockSpec((tile_b, D_out), lambda i: (i, 0))
    out_shape = jax.ShapeDtypeStruct((B, D_out), x.dtype)

    flops = 2 * B * D_in * D_out
    base_bytes = 4 * (B * D_in + D_in * D_out + D_out + B * D_out)

    if not training:
        return pl.pallas_call(
            _tower_kernel_eval,
            out_shape=out_shape,
            grid_spec=pltpu.PrefetchScalarGridSpec(
                num_scalar_prefetch=0,
                grid=grid,
                in_specs=[x_spec, w_spec, b_spec],
                out_specs=o_spec,
            ),
            compiler_params=pltpu.CompilerParams(
                dimension_semantics=("parallel",)),
            cost_estimate=pl.CostEstimate(
                flops=flops, transcendentals=0, bytes_accessed=base_bytes),
        )(x, w, b2)

    # --- training path: inverted dropout via precomputed uint32 bits --------
    if rng_key is None:
        rng_key = jax.random.PRNGKey(0)
    keep_prob = 1.0 - float(drop_prob)
    keep_threshold = min(int(round(keep_prob * (1 << 32))), (1 << 32) - 1)
    inv_keep = 1.0 / keep_prob

    bits = jax.random.bits(rng_key, (B, D_out), dtype=jnp.uint32)
    bits_spec = pl.BlockSpec((tile_b, D_out), lambda i: (i, 0))

    kernel = functools.partial(_tower_kernel_train,
                               keep_threshold=keep_threshold,
                               inv_keep=inv_keep)
    return pl.pallas_call(
        kernel,
        out_shape=out_shape,
        grid_spec=pltpu.PrefetchScalarGridSpec(
            num_scalar_prefetch=0,
            grid=grid,
            in_specs=[x_spec, w_spec, b_spec, bits_spec],
            out_specs=o_spec,
        ),
        compiler_params=pltpu.CompilerParams(
            dimension_semantics=("parallel",)),
        cost_estimate=pl.CostEstimate(
            flops=flops, transcendentals=0,
            bytes_accessed=base_bytes + 4 * B * D_out),
    )(x, w, b2, bits)


def init_tower_params(key, input_dim, out_dim):
    """Deterministic init mimicking nn.Linear default (uniform +-1/sqrt(fan_in))."""
    kw, kb = jax.random.split(key)
    bound = 1.0 / jnp.sqrt(input_dim)
    # store weight as [D_in, D_out] (transpose of torch's [out, in])
    w = jax.random.uniform(kw, (input_dim, out_dim), jnp.float32, -bound, bound)
    b = jax.random.uniform(kb, (out_dim,), jnp.float32, -bound, bound)
    return w, b


if __name__ == "__main__":
    # Shapes consistent with Tower(input_dim=32, dims=[128, 64, 16]); only the
    # first `dims` entry is used by the module's forward.  B kept small.
    B, D_IN, D_OUT = 64, 32, 128

    key = jax.random.PRNGKey(0)
    kx, kp, kd = jax.random.split(key, 3)
    x = jax.random.normal(kx, (B, D_IN), dtype=jnp.float32)
    w, b = init_tower_params(kp, D_IN, D_OUT)

    # Eval-mode forward (dropout == identity), the deterministic hot path.
    out = jax.block_until_ready(
        tower_forward(x, w, b, drop_prob=0.1, training=False))
    ref = jnp.maximum(x @ w + b, 0.0)
    assert out.shape == (B, D_OUT)
    assert jnp.allclose(out, ref, atol=1e-5, rtol=1e-5)

    # Training-mode path (inverted dropout with precomputed bits); verify
    # against a plain-JAX reference using the same bits.
    out_train = jax.block_until_ready(
        tower_forward(x, w, b, drop_prob=0.1, training=True, rng_key=kd))
    bits = jax.random.bits(kd, (B, D_OUT), dtype=jnp.uint32)
    keep = bits < jnp.uint32(min(int(round(0.9 * (1 << 32))), (1 << 32) - 1))
    ref_train = jnp.where(keep, ref / 0.9, 0.0)
    assert out_train.shape == (B, D_OUT)
    assert jnp.allclose(out_train, ref_train, atol=1e-5, rtol=1e-5)

    print("KERNEL_OK")
</pallas_src>

<mosaic_0001>
module attributes {stable_mosaic.version = 11 : i64} {
  func.func @_tower_kernel_eval(%arg0: i32, %arg1: memref<64x32xf32, #tpu.memory_space<vmem>>, %arg2: memref<32x128xf32, #tpu.memory_space<vmem>>, %arg3: memref<1x128xf32, #tpu.memory_space<vmem>>, %arg4: memref<64x128xf32, #tpu.memory_space<vmem>>) attributes {dimension_semantics = [#tpu.dimension_semantics<parallel>], iteration_bounds = array<i64: 1>, scalar_prefetch = 0 : i64, scratch_operands = 0 : i64, tpu.core_type = #tpu.core_type<tc>, window_params = [{transform_indices = @transform_0, window_bounds = array<i64: 64, 32>}, {pipeline_mode = #tpu.pipeline_mode<synchronous>, transform_indices = @transform_1, window_bounds = array<i64: 32, 128>}, {pipeline_mode = #tpu.pipeline_mode<synchronous>, transform_indices = @transform_2, window_bounds = array<i64: 1, 128>}, {transform_indices = @transform_3, window_bounds = array<i64: 64, 128>}]} {
    %c0 = arith.constant 0 : index
    %c0_0 = arith.constant 0 : index
    %0 = vector.load %arg1[%c0, %c0_0] : memref<64x32xf32, #tpu.memory_space<vmem>>, vector<64x32xf32>
    %c0_1 = arith.constant 0 : index
    %c0_2 = arith.constant 0 : index
    %1 = vector.load %arg2[%c0_1, %c0_2] : memref<32x128xf32, #tpu.memory_space<vmem>>, vector<32x128xf32>
    %cst = arith.constant dense<0.000000e+00> : vector<64x128xf32>
    %2 = tpu.matmul %0, %1, %cst {dimension_numbers = #tpu.dot_dimension_numbers<[1], [0], [0], [1], [0, 0, 1, 1], [], []>} : vector<64x32xf32>, vector<32x128xf32>, vector<64x128xf32> -> vector<64x128xf32>
    %c0_3 = arith.constant 0 : index
    %c0_4 = arith.constant 0 : index
    %3 = vector.load %arg3[%c0_3, %c0_4] : memref<1x128xf32, #tpu.memory_space<vmem>>, vector<1x128xf32>
    %4 = vector.broadcast %3 : vector<1x128xf32> to vector<64x128xf32>
    %5 = arith.addf %2, %4 : vector<64x128xf32>
    %cst_5 = arith.constant 0.000000e+00 : f32
    %6 = vector.broadcast %cst_5 : f32 to vector<64x128xf32>
    %7 = arith.maximumf %5, %6 : vector<64x128xf32>
    %c0_6 = arith.constant 0 : index
    %c0_7 = arith.constant 0 : index
    %8 = vector.load %arg4[%c0_6, %c0_7] : memref<64x128xf32, #tpu.memory_space<vmem>>, vector<64x128xf32>
    tpu.vector_store %arg4[%c0_6, %c0_7], %7 {strides = array<i32>} : memref<64x128xf32, #tpu.memory_space<vmem>>, vector<64x128xf32>,
    return
  }
  func.func @transform_0(%arg0: i32) -> (i32, i32) {
    %c0_i32 = arith.constant 0 : i32
    %c0_i32_0 = arith.constant 0 : i32
    return %arg0, %c0_i32 : i32, i32
  }
  func.func @transform_1(%arg0: i32) -> (i32, i32) {
    %c0_i32 = arith.constant 0 : i32
    %c0_i32_0 = arith.constant 0 : i32
    %c0_i32_1 = arith.constant 0 : i32
    return %c0_i32, %c0_i32_0 : i32, i32
  }
  func.func @transform_2(%arg0: i32) -> (i32, i32) {
    %c0_i32 = arith.constant 0 : i32
    %c0_i32_0 = arith.constant 0 : i32
    %c0_i32_1 = arith.constant 0 : i32
    return %c0_i32, %c0_i32_0 : i32, i32
  }
  func.func @transform_3(%arg0: i32) -> (i32, i32) {
    %c0_i32 = arith.constant 0 : i32
    %c0_i32_0 = arith.constant 0 : i32
    return %arg0, %c0_i32 : i32, i32
  }
}

</mosaic_0001>

<bundles_post_ra>
// kernel: tpu_custom_call.1
= control target key start
LH: loop header
LB: loop body
LE: loop exit
PB: predicated region body
PF: predicated region fallthrough
CT: control target
= control target key end

     0   :  { %vm34_vm0 = vcmask 261120   ;;  %s358_s0 = inlined_call_operand.vmem [shape: f32[64,32], index: 0, kind: input, shape index: {}]   ;;  %s359_s1 = inlined_call_operand.vmem [shape: f32[32,128], index: 1, kind: input, shape index: {}]   ;;  %s360_s2 = inlined_call_operand.vmem [shape: f32[1,128], index: 2, kind: input, shape index: {}]   ;;  %s361_s3 = inlined_call_operand.hbm [shape: f32[64,128], index: 3, kind: output, shape index: {}]  }
   0x1   :  { %v23_v0 = vld [vmem:[%s359_s1] sm:$0xff]  ;;  %v24_v1 = vld [vmem:[%s359_s1 + $0x8] sm:$0xff]  ;;  %v25_v2 = vld [vmem:[%s359_s1 + $0x10] sm:$0xff] }
   0x2   :  { %v237_v3 = vpack.c.bf16 %v24_v1, %v23_v0  ;;  %v26_v4 = vld [vmem:[%s359_s1 + $0x18] sm:$0xff]  ;;  %v15_v5 = vld [vmem:[%s358_s0] sm:$0xff] }
   0x3   :  { %v19_v6 = vld [vmem:[%s358_s0 + $0x20] sm:$0xff]  ;;  %v241_v7 = vpack.c.bf16 %v26_v4, %v25_v2  ;;  %225 = vmatprep.mubr.msk.f32.mxu0 %vm34_vm0, %v15_v5 }
   0x4   :  { %231 = vmatprep.mubr.msk.f32.mxu1 %vm34_vm0, %v19_v6  ;;  %238 = vmatprep.subr.bf16.mxu0 %v237_v3 }
   0x5   :  { %245 = vmatprep.subr.bf16.mxu1 %v237_v3  ;;  %240 = vmatpush3.bf16.msra.mxu0 %v237_v3 }
   0x6   :  { %247 = vmatpush3.bf16.msra.mxu1 %v237_v3 }
   0x7   :  { %8 = vsyncpa [#allocation3], 0  ;;  %242 = vmatprep.subr.bf16.mxu0 %v241_v7  ;;  %246 = vmatprep.subr.bf16.mxu1 %v241_v7  ;;  %v16_v8 = vld [vmem:[%s358_s0 + $0x8] sm:$0xff]  ;;  %v17_v10 = vld [vmem:[%s358_s0 + $0x10] sm:$0xff] }
   0x8   :  { %v20_v9 = vld [vmem:[%s358_s0 + $0x28] sm:$0xff]  ;;  %v21_v11 = vld [vmem:[%s358_s0 + $0x30] sm:$0xff]  ;;  %v18_v12 = vld [vmem:[%s358_s0 + $0x18] sm:$0xff] }
   0x9   :  { %244 = vmatpush3.bf16.msra.mxu0 %v241_v7  ;;  %v22_v13 = vld [vmem:[%s358_s0 + $0x38] sm:$0xff]  ;;  %v196_v14 = vld [vmem:[%s360_s2] ss:$0 sm:$0xff]  ;;  %s276_s0 = smov [#allocation2]  }
   0xa   :  { %248 = vmatpush3.bf16.msra.mxu1 %v241_v7  ;;  %s185_s10 = sshll.u32 %s276_s0, 4  ;;  %s186_s10 = int_to_ptr.vmem [resolvable:$true] %s185_s10 }
   0xb   :  { %s252_s2 = scalar_lea.vmem %s186_s10, 1024  ;;  %p257_p1 = scmp.lt.s32.totalorder %s186_s10, %s186_s10 }
   0xc   :  { %226 = vmatmul.mubr.msk.f32.vlgmr.msra.gmra.mrb[0].mxu0 %vm34_vm0, %v16_v8  ;;  %p253_p0 = scmp.ne.s32.totalorder %s186_s10, %s252_s2  ;;  %p258_p2 = scmp.lt.s32.totalorder %s252_s2, %s252_s2 }
   0xd   :  { %232 = vmatmul.mubr.msk.f32.vlgmr.msra.gmra.mrb[0].mxu1 %vm34_vm0, %v20_v9  ;;  %228 = vmatprep.mubr.msk.f32.mxu0 %vm34_vm0, %v17_v10 }
   0xe   :  { %234 = vmatprep.mubr.msk.f32.mxu1 %vm34_vm0, %v21_v11  ;;  %p259_p3 = por %p258_p2, %p257_p1 }
  0x10   :  { %229 = vmatmul.mubr.msk.f32.gmra.mrb[2].mxu0 %vm34_vm0, %v18_v12  ;;  %p260_p4 = pnand %p259_p3, %p253_p0 }
  0x11   :  { %235 = vmatmul.mubr.msk.f32.gmra.mrb[2].mxu1 %vm34_vm0, %v22_v13 }
  0xdf   :  { %v227_v15 = vpop.f32.mrb[0].mxu0 }
  0xe0   :  { %v233_v16 = vpop.f32.mrb[0].mxu1  ;;  %v131_v17 = vadd.f32 %v227_v15, %v196_v14  ;;  %v125_v19 = vpop.f32.mrb[1].mxu0 }
  0xe1   :  { %v151_v18 = vadd.f32 %v233_v16, %v196_v14  ;;  %v145_v20 = vpop.f32.mrb[1].mxu1  ;;  %v126_v21 = vadd.f32 %v196_v14, %v125_v19 }
  0xe2   :  { %v146_v22 = vadd.f32 %v196_v14, %v145_v20  ;;  %v165_v23 = vmax.f32 %v131_v17, 0.0 }
  0xe3   :  { %v169_v24 = vmax.f32 %v151_v18, 0.0  ;;  %v164_v25 = vmax.f32 %v126_v21, 0.0  ;;  %v230_v27 = vpop.f32.mrb[2].mxu0 }
  0xe4   :  { %v168_v26 = vmax.f32 %v146_v22, 0.0  ;;  %v236_v28 = vpop.f32.mrb[2].mxu1  ;;  %173 = vst [vmem:[#allocation2 + $0x8] sm:$0xff] %v165_v23  ;;  %v141_v29 = vadd.f32 %v230_v27, %v196_v14  ;;  %v135_v31 = vpop.f32.mrb[3].mxu0 }
  0xe5   :  { %177 = vst [vmem:[#allocation2 + $0x28] sm:$0xff] %v169_v24  ;;  %v161_v30 = vadd.f32 %v236_v28, %v196_v14  ;;  %v155_v32 = vpop.f32.mrb[3].mxu1  ;;  %172 = vst [vmem:[#allocation2] sm:$0xff] %v164_v25  ;;  %v136_v33 = vadd.f32 %v196_v14, %v135_v31 }
  0xe6   :  { %176 = vst [vmem:[#allocation2 + $0x20] sm:$0xff] %v168_v26  ;;  %v156_v34 = vadd.f32 %v196_v14, %v155_v32  ;;  %v167_v35 = vmax.f32 %v141_v29, 0.0 }
  0xe7   :  { %v171_v36 = vmax.f32 %v161_v30, 0.0  ;;  %v166_v37 = vmax.f32 %v136_v33, 0.0 }
  0xe8   :  { %v170_v38 = vmax.f32 %v156_v34, 0.0  ;;  %175 = vst [vmem:[#allocation2 + $0x18] sm:$0xff] %v167_v35 }
  0xe9   :  { %179 = vst [vmem:[#allocation2 + $0x38] sm:$0xff] %v171_v36  ;;  %174 = vst [vmem:[#allocation2 + $0x10] sm:$0xff] %v166_v37 }
  0xea   :  { %178 = vst [vmem:[#allocation2 + $0x30] sm:$0xff] %v170_v38 }
  0xeb   :  { %263 = shalt.err (!%p260_p4)
}
  0xec   :  { %s264_s13 = scalar_lea.hbm %s361_s3, 1024 }
  0xed   :  { %p265_p5 = scmp.ne.s32.totalorder %s361_s3, %s264_s13  ;;  %p268_p6 = scmp.lt.u32.totalorder %s264_s13, %s361_s3 }
  0xef   :  { %p270_p7 = pnand %p268_p6, %p265_p5 }
  0xf1   :  { %273 = shalt.err (!%p270_p7)
}
  0xf2   :  { %s277_s18 = smov 128   ;;  %s278_s19 = smov 8  }
  0xf3   :  { %191 = dma.vmem_to_hbm [thread:$0]  %s186_s10, 1024, %s361_s3, [#allocation3], %s277_s18, %s277_s18, %s278_s19  }
  0xf4   :  { %274 = dma.done.wait [#allocation3], 1024  }
  0xf5   :  { %275 = vsyncadd [#allocation3], 4294966272 }
  0xf6   :  { %195 = vsyncpa [#allocation3], 1 }

</bundles_post_ra>
